<compile_context>
chip_gen: v6e
topology: v6e:2x2x1
jax: 0.10.0
libtpu: 0.0.40
codegen_flags: <defaults>
</compile_context>

<pallas_src>
from typing import List

import jax
import jax.numpy as jnp
from jax.experimental import pallas as pl
from jax.experimental.pallas import tpu as pltpu


def _gather_rows_kernel(ids_ref, w_hbm, out_ref, gathered, sem):
    """One grid step == one batch tile, all fields at once.

    ids_ref  : SMEM (B_pad*F,) int32  flattened (x + offsets), scalar-prefetched
    w_hbm    : HBM  (V, F*D)          fused embedding tables (never enter VMEM)
    out_ref  : VMEM (TB*F, F*D)       lane-dense fused embeddings for this tile
    gathered : VMEM (TB*F, F*D)       scratch the row DMAs land in
    sem      : DMA semaphores (1,)
    """
    rows = out_ref.shape[0]                       # TB * F (static)
    base = pl.program_id(0) * rows

    # Issue all row gathers (HBM -> VMEM), then wait for all of them.  Every
    # copy has the same size and signals the same semaphore, so `rows` waits
    # complete only once every row has landed.
    @pl.loop(0, rows)
    def _start(r):
        rid = ids_ref[base + r]
        pltpu.make_async_copy(w_hbm.at[pl.ds(rid, 1), :],
                              gathered.at[pl.ds(r, 1), :],
                              sem.at[0]).start()

    @pl.loop(0, rows)
    def _wait(r):
        pltpu.make_async_copy(w_hbm.at[pl.ds(0, 1), :],
                              gathered.at[pl.ds(r, 1), :],
                              sem.at[0]).wait()

    out_ref[...] = gathered[...]                  # single unmasked lane-dense store


def fuse_weights(tables: jnp.ndarray) -> jnp.ndarray:
    """(F, V, D) -> (V, F*D).  Do this ONCE at parameter-prep time."""
    F, V, D = tables.shape
    return jnp.transpose(tables, (1, 0, 2)).reshape(V, F * D)


def field_aware_embedding(x: jnp.ndarray,
                          w_fused: jnp.ndarray,
                          offsets: jnp.ndarray,
                          *,
                          block_batch: int | None = None) -> jnp.ndarray:
    """Pallas-backed forward of FieldAwareEmbedding.

    x       : (B, F) int indices
    w_fused : (V, F*D) fused tables (from fuse_weights)
    offsets : (F,) int32
    returns : fused (B, F, F, D);  out[b, j, f, :] == E_f(x[b, j] + offsets[j]),
              i.e. PyTorch field_embs[f] == out[:, :, f, :].
    """
    B, F = x.shape
    V, FD = w_fused.shape
    assert FD % F == 0 and offsets.shape[0] == F
    D = FD // F
    itemsize = jnp.dtype(w_fused.dtype).itemsize

    # Batch tile: ~512 gathered rows (TB*F) per grid step, TB a multiple of 8.
    # Never fall back to TB=B -- pad the batch up to a multiple of TB instead.
    if block_batch is None:
        target_rows = 512
        block_batch = max(8, ((-(-target_rows // F) + 7) // 8) * 8)
    TB = max(8, ((min(block_batch, ((B + 7) // 8) * 8) + 7) // 8) * 8)
    # Prefer >=2 grid steps (two TensorCores on v7x) when the batch allows it.
    if ((B + TB - 1) // TB) < 2 and B >= 16:
        TB = max(8, (((B + 1) // 2 + 7) // 8) * 8)
    B_pad = ((B + TB - 1) // TB) * TB
    grid = (B_pad // TB,)
    rows = TB * F

    # Hoisted out of the kernel: offset add + flatten (+ pad) in plain XLA.
    ids = (x.astype(jnp.int32) + offsets.astype(jnp.int32)[None, :]).reshape(-1)
    if B_pad != B:
        ids = jnp.concatenate([ids, jnp.zeros(((B_pad - B) * F,), jnp.int32)])

    tile_bytes = rows * FD * itemsize
    vmem_limit = int(min(100 * 2**20, 16 * 2**20 + 4 * tile_bytes))

    out = pl.pallas_call(
        _gather_rows_kernel,
        out_shape=jax.ShapeDtypeStruct((B_pad * F, FD), w_fused.dtype),
        grid_spec=pltpu.PrefetchScalarGridSpec(
            num_scalar_prefetch=1,                         # ids -> SMEM
            grid=grid,
            in_specs=[pl.BlockSpec(memory_space=pl.ANY)],  # fused table stays in HBM
            out_specs=pl.BlockSpec((rows, FD), lambda b, ids: (b, 0)),
            scratch_shapes=[pltpu.VMEM((rows, FD), w_fused.dtype),
                            pltpu.SemaphoreType.DMA((1,))]),
        compiler_params=pltpu.CompilerParams(
            dimension_semantics=("parallel",),             # megacore on v7x
            vmem_limit_bytes=vmem_limit),
    )(ids, w_fused)

    if B_pad != B:
        out = out[:B * F]
    return out.reshape(B, F, F, D)


def split_fields(fused: jnp.ndarray) -> List[jnp.ndarray]:
    """Optional PyTorch-compatible list view (materializes F strided copies;
    avoid in hot paths -- keep the fused layout downstream when possible)."""
    return [fused[:, :, f, :] for f in range(fused.shape[2])]


def init_params(key, field_dims: List[int], embed_dim: int):
    """Deterministic xavier-uniform init of the F per-field tables (F, V, D)."""
    num_fields = len(field_dims)
    vocab = int(sum(field_dims))
    bound = (6.0 / (vocab + embed_dim)) ** 0.5     # xavier_uniform_ on (V, D)
    keys = jax.random.split(key, num_fields)
    tables = jnp.stack(
        [jax.random.uniform(k, (vocab, embed_dim), jnp.float32, -bound, bound)
         for k in keys], axis=0)                   # (F, V, D)
    offsets = jnp.array(
        [0] + list(jnp.cumsum(jnp.array(field_dims))[:-1]), dtype=jnp.int32)
    return tables, offsets


def reference(x, tables, offsets):
    """Pure-JAX reference for correctness checking."""
    xi = x.astype(jnp.int32) + offsets[None, :]
    return [tables[f][xi] for f in range(tables.shape[0])]


if __name__ == "__main__":
    key = jax.random.PRNGKey(0)

    field_dims = [3, 4, 5, 4]       # num_fields = 4, vocab = 16
    embed_dim = 32                  # F * D = 128 -> lane-dense fused output
    batch = 8

    k_param, k_x = jax.random.split(key)
    tables, offsets = init_params(k_param, field_dims, embed_dim)
    w_fused = fuse_weights(tables)                 # once, at parameter-prep time

    cols = [
        jax.random.randint(jax.random.fold_in(k_x, f), (batch,), 0, field_dims[f])
        for f in range(len(field_dims))
    ]
    x = jnp.stack(cols, axis=1).astype(jnp.int32)  # (batch, num_fields)

    fused = jax.block_until_ready(field_aware_embedding(x, w_fused, offsets))
    assert fused.shape == (batch, len(field_dims), len(field_dims), embed_dim)

    refs = reference(x, tables, offsets)
    for f, r in enumerate(refs):
        assert r.shape == (batch, len(field_dims), embed_dim)
        assert jnp.allclose(fused[:, :, f, :], r, atol=0.0), "mismatch vs reference"

    print("KERNEL_OK")
</pallas_src>

<mosaic_0001>
module attributes {stable_mosaic.version = 11 : i64} {
  func.func @_gather_rows_kernel(%arg0: i32, %arg1: memref<32xi32, #tpu.memory_space<smem>>, %arg2: memref<16x128xf32, #tpu.memory_space<any>>, %arg3: memref<32x128xf32, #tpu.memory_space<vmem>>, %arg4: memref<32x128xf32, #tpu.memory_space<vmem>>, %arg5: memref<1x!tpu.dma_semaphore, #tpu.memory_space<semaphore_mem>>) attributes {dimension_semantics = [#tpu.dimension_semantics<parallel>], iteration_bounds = array<i64: 1>, scalar_prefetch = 1 : i64, scratch_operands = 2 : i64, tpu.core_type = #tpu.core_type<tc>, window_params = [{}, {transform_indices = @transform_1, window_bounds = array<i64: 32, 128>}]} {
    %c32_i32 = arith.constant 32 : i32
    %0 = arith.muli %arg0, %c32_i32 : i32
    %c0_i32 = arith.constant 0 : i32
    %c32_i32_0 = arith.constant 32 : i32
    %1 = arith.addi %c0_i32, %c32_i32_0 : i32
    %c1_i32 = arith.constant 1 : i32
    scf.for %arg6 = %c0_i32 to %1 step %c1_i32  : i32 {
      %c1_i32_9 = arith.constant 1 : i32
      %5 = arith.muli %arg6, %c1_i32_9 : i32
      %c0_i32_10 = arith.constant 0 : i32
      %6 = arith.addi %c0_i32_10, %5 : i32
      %7 = arith.addi %0, %6 : i32
      %8 = arith.index_cast %7 : i32 to index
      %9 = memref.load %arg1[%8] : memref<32xi32, #tpu.memory_space<smem>>
      %c0_i32_11 = arith.constant 0 : i32
      %c0_i32_12 = arith.constant 0 : i32
      %10 = tpu.memref_slice %arg2[%9, %c0_i32_12] : memref<16x128xf32, #tpu.memory_space<any>> -> memref<1x128xf32, #tpu.memory_space<any>>
      %c0_i32_13 = arith.constant 0 : i32
      %11 = tpu.memref_slice %arg4[%6, %c0_i32_13] : memref<32x128xf32, #tpu.memory_space<vmem>> -> memref<1x128xf32, #tpu.memory_space<vmem>>
      %12 = tpu.memref_slice %arg5[%c0_i32_11] : memref<1x!tpu.dma_semaphore, #tpu.memory_space<semaphore_mem>> -> memref<1x!tpu.dma_semaphore, #tpu.memory_space<semaphore_mem>>
      %13 = tpu.memref_squeeze %12 : memref<1x!tpu.dma_semaphore, #tpu.memory_space<semaphore_mem>> -> memref<!tpu.dma_semaphore, #tpu.memory_space<semaphore_mem>>
      tpu.enqueue_dma source(%10 : memref<1x128xf32, #tpu.memory_space<any>>) target(%11 : memref<1x128xf32, #tpu.memory_space<vmem>>) target_semaphore(%13 : memref<!tpu.dma_semaphore, #tpu.memory_space<semaphore_mem>>)
    }
    %c32_i32_1 = arith.constant 32 : i32
    %c0_i32_2 = arith.constant 0 : i32
    %c32_i32_3 = arith.constant 32 : i32
    %2 = arith.addi %c0_i32_2, %c32_i32_3 : i32
    %c1_i32_4 = arith.constant 1 : i32
    scf.for %arg6 = %c0_i32_2 to %2 step %c1_i32_4  : i32 {
      %c1_i32_9 = arith.constant 1 : i32
      %5 = arith.muli %arg6, %c1_i32_9 : i32
      %c0_i32_10 = arith.constant 0 : i32
      %6 = arith.addi %c0_i32_10, %5 : i32
      %c0_i32_11 = arith.constant 0 : i32
      %c0_i32_12 = arith.constant 0 : i32
      %c0_i32_13 = arith.constant 0 : i32
      %7 = tpu.memref_slice %arg2[%c0_i32_12, %c0_i32_13] : memref<16x128xf32, #tpu.memory_space<any>> -> memref<1x128xf32, #tpu.memory_space<any>>
      %c0_i32_14 = arith.constant 0 : i32
      %8 = tpu.memref_slice %arg4[%6, %c0_i32_14] : memref<32x128xf32, #tpu.memory_space<vmem>> -> memref<1x128xf32, #tpu.memory_space<vmem>>
      %9 = tpu.memref_slice %arg5[%c0_i32_11] : memref<1x!tpu.dma_semaphore, #tpu.memory_space<semaphore_mem>> -> memref<1x!tpu.dma_semaphore, #tpu.memory_space<semaphore_mem>>
      %10 = tpu.memref_squeeze %9 : memref<1x!tpu.dma_semaphore, #tpu.memory_space<semaphore_mem>> -> memref<!tpu.dma_semaphore, #tpu.memory_space<semaphore_mem>>
      tpu.wait_dma2 semaphore(%10 : memref<!tpu.dma_semaphore, #tpu.memory_space<semaphore_mem>>) src(%7 : memref<1x128xf32, #tpu.memory_space<any>>) dst(%8 : memref<1x128xf32, #tpu.memory_space<vmem>>)
    }
    %c32_i32_5 = arith.constant 32 : i32
    %c0 = arith.constant 0 : index
    %c0_6 = arith.constant 0 : index
    %3 = vector.load %arg4[%c0, %c0_6] : memref<32x128xf32, #tpu.memory_space<vmem>>, vector<32x128xf32>
    %c0_7 = arith.constant 0 : index
    %c0_8 = arith.constant 0 : index
    %4 = vector.load %arg3[%c0_7, %c0_8] : memref<32x128xf32, #tpu.memory_space<vmem>>, vector<32x128xf32>
    tpu.vector_store %arg3[%c0_7, %c0_8], %3 {strides = array<i32>} : memref<32x128xf32, #tpu.memory_space<vmem>>, vector<32x128xf32>,
    return
  }
  func.func @transform_1(%arg0: i32, %arg1: memref<32xi32, #tpu.memory_space<smem>>) -> (i32, i32) {
    %c0_i32 = arith.constant 0 : i32
    %c0_i32_0 = arith.constant 0 : i32
    return %arg0, %c0_i32 : i32, i32
  }
}

</mosaic_0001>

<bundles_post_ra>
// kernel: tpu_custom_call.1
= control target key start
LH: loop header
LB: loop body
LE: loop exit
PB: predicated region body
PF: predicated region fallthrough
CT: control target
= control target key end

     0   :  { %s181_s9 = smov [#allocation5]   ;;  %s226_s0 = inlined_call_operand.hbm [shape: s32[32], index: 0, kind: input, shape index: {}]   ;;  %s227_s1 = inlined_call_operand.hbm [shape: f32[16,128], index: 1, kind: input, shape index: {}]   ;;  %s228_s2 = inlined_call_operand.hbm [shape: f32[32,128], index: 2, kind: output, shape index: {}]  }
   0x1   :  { %8 = dma.hbm_to_smem %s226_s0, 16, %s181_s9, [#allocation4] }
   0x2   :  { %167 = dma.done.wait [#allocation4], 16 }
   0x3   :  { %168 = vsyncadd [#allocation4], 4294967280 }
   0x4   :  { %10 = sfence }
   0x5   :  { %11 = vsyncpa [#allocation7], 0  ;;  %s204_s12 = smov 0  }
   0x6 LB: > { %s20_s13 = sld [smem:[#allocation5 + %s175_s12]]  ;;  %s23_s14 = scalar_lea.vmem [#allocation2], %s175_s12  ;;  %s175_s12 = sphi %s204_s12, %s18_s12  }
   0x7   : > { %s31_s15 = sshll.u32 %s23_s14, 4  ;;  %s119_s22 = scalar_lea.hbm %s227_s1, 256  ;;  %s32_s15 = int_to_ptr.vmem [resolvable:$true] %s31_s15 }
   0xc   : > { %s87_s16 = sshll.u32 %s20_s13, 4 }
   0xd   : > { %s22_s18 = scalar_lea.hbm %s227_s1, %s87_s16 }
   0xe   : > { %s117_s19 = scalar_lea.hbm %s22_s18, 16  ;;  %p120_p1 = scmp.lt.s32.totalorder %s22_s18, %s227_s1 }
   0xf   : > { %p118_p0 = scmp.ne.s32.totalorder %s22_s18, %s117_s19  ;;  %p121_p2 = scmp.lt.s32.totalorder %s119_s22, %s117_s19 }
  0x11   : > { %p122_p3 = por %p121_p2, %p120_p1 }
  0x13   : > { %p123_p4 = pnand %p122_p3, %p118_p0 }
  0x15   : > { %126 = shalt.err (!%p123_p4)  }
  0x16   : > { %s127_s25 = scalar_lea.vmem %s32_s15, 16  ;;  %s182_s26 = smov [#allocation2]  }
  0x17   : > { %p128_p5 = scmp.ne.s32.totalorder %s32_s15, %s127_s25  ;;  %s129_s27 = sshll.u32 %s182_s26, 4  ;;  %s130_s27 = int_to_ptr.vmem [resolvable:$false] %s129_s27 }
  0x18   : > { %s131_s28 = scalar_lea.vmem %s130_s27, 512  ;;  %p132_p6 = scmp.lt.s32.totalorder %s32_s15, %s130_s27 }
  0x19   : > { %p133_p7 = scmp.lt.s32.totalorder %s131_s28, %s127_s25 }
  0x1b   : > { %p134_p8 = por %p133_p7, %p132_p6 }
  0x1d   : > { %p135_p9 = pnand %p134_p8, %p128_p5 }
  0x1f   : > { %138 = shalt.err (!%p135_p9)  }
  0x20   : > { %34 = dma.hbm_to_vmem [thread:$0]  %s22_s18, 16, %s32_s15, [#allocation3] }
  0x21   : > { %s18_s12 = sadd.s32 1, %s175_s12  }
  0x22   : > { %p15_p10 = scmp.ge.s32.totalorder %s18_s12, 32  }
  0x23   :  { %s177_s29 = smov (%p15_p10), 0  }
  0x24   :  { %17 = sbr.rel (!%p15_p10) target bundleno = 6 (0x6), region = 40 }
  0x29 LB: > { %169 = dma.done.wait [#allocation3], 16  ;;  %s179_s29 = sphi %s177_s29, %s40_s29  }
  0x2a   : > { %170 = vsyncadd [#allocation3], 4294967280  ;;  %s40_s29 = sadd.s32 1, %s179_s29  }
  0x2b   : > { %p37_p11 = scmp.ge.s32.totalorder %s40_s29, 32  }
  0x2c   :  { %v44_v0 = vld [vmem:[#allocation2] sm:$0xff] (%p37_p11)  ;;  %v45_v1 = vld [vmem:[#allocation2 + $0x8] sm:$0xff] (%p37_p11)  ;;  %v46_v2 = vld [vmem:[#allocation2 + $0x10] sm:$0xff] (%p37_p11)  ;;  %s183_s30 = smov (%p37_p11), [#allocation6]  }
  0x2d   :  { %39 = sbr.rel (!%p37_p11) target bundleno = 41 (0x29), region = 51  ;;  %48 = vst [vmem:[#allocation6] sm:$0xff] (%p37_p11), %v44_v0  ;;  %49 = vst [vmem:[#allocation6 + $0x8] sm:$0xff] (%p37_p11), %v45_v1  ;;  %v47_v3 = vld [vmem:[#allocation2 + $0x18] sm:$0xff] (%p37_p11)  ;;  %s57_s3 = sshll.u32 (%p37_p11), %s183_s30, 4  ;;  %s58_s3 = int_to_ptr.vmem [resolvable:$true] %s57_s3 }
  0x2e   :  { %50 = vst [vmem:[#allocation6 + $0x10] sm:$0xff] (%p37_p11), %v46_v2  ;;  %51 = vst [vmem:[#allocation6 + $0x18] sm:$0xff] (%p37_p11), %v47_v3  ;;  %s139_s1 = scalar_lea.vmem (%p37_p11), %s58_s3, 512  ;;  %p144_p13 = scmp.lt.s32.totalorder (%p37_p11), %s58_s3, %s58_s3 }
  0x2f   :  { %p140_p12 = scmp.ne.s32.totalorder (%p37_p11), %s58_s3, %s139_s1  ;;  %p145_p0 = scmp.lt.s32.totalorder (%p37_p11), %s139_s1, %s139_s1 }
  0x31   :  { %p146_p1 = por (%p37_p11), %p145_p0, %p144_p13 }
  0x33   :  { %p147_p2 = pnand %p146_p1, %p140_p12 }
  0x35   :  { %150 = shalt.err (!%p147_p2)
}
  0x36   :  { %s184_s4 = smov 128   ;;  %s185_s5 = smov 8  }
  0x37   :  { %63 = dma.vmem_to_hbm [thread:$0]  %s58_s3, 512, %s228_s2, [#allocation7], %s184_s4, %s184_s4, %s185_s5  }
  0x38   :  { %171 = dma.done.wait [#allocation7], 512  }
  0x39   :  { %172 = vsyncadd [#allocation7], 4294966784 }
  0x3a   :  { %67 = vsyncpa [#allocation7], 1 }
  0x3b   :  { %68 = vsyncmov [#allocation3] }
  0x3e   :  { %s69_s8 = vpop.sfrf %68 }
  0x3f   :  { %p88_p3 = scmp.ne.s32.totalorder %s69_s8, 0 }
  0x41   :  { %73 = shalt.err (%p88_p3)  }

</bundles_post_ra>
